<compile_context>
chip_gen: v7x
topology: tpu7x:2x2x1
jax: 0.10.0
libtpu: 0.0.40
codegen_flags: <defaults>
</compile_context>

<pallas_src>
import jax
import jax.numpy as jnp
from jax.experimental import pallas as pl
from jax.experimental.pallas import tpu as pltpu

EPS = 1e-5


def _block_kernel(x_ref, w1_ref, w23_ref, w4_ref, vec_ref, o_ref):
    # x_ref:   (N, Cin_p, L)       input in NCL layout, channels padded to 8k
    # w1_ref:  (Cout, 5*Cin_p)     im2col weight, conv1
    # w23_ref: (2, Cout, 5*Cout)   im2col weights, conv2 / conv3
    # w4_ref:  (Cout, 3*Cout)      im2col weight, conv4 (k=3, pad=1)
    # vec_ref: (Cout, 8)           columns: b1 b2 b3 b4 g1 be1 g2 be2
    # o_ref:   (N, Cout, L-12)
    N, _, L = x_ref.shape
    Cout, L3 = o_ref.shape[1], o_ref.shape[2]
    L1, L2 = L - 4, L - 8

    x = x_ref[...].astype(jnp.float32)
    vec = vec_ref[...]
    b1, b2, b3, b4 = vec[:, 0:1], vec[:, 1:2], vec[:, 2:3], vec[:, 3:4]
    g1, be1, g2, be2 = vec[:, 4:5], vec[:, 5:6], vec[:, 6:7], vec[:, 7:8]

    def conv_valid(seg_fn, Lin, K, w2d, b_col):
        # One im2col matmul for the whole batch.
        #   slab[k*C + c, n*Lout + l] = seg_fn(n)[c, l + k]
        Lout = Lin - K + 1
        slabs = [
            jnp.concatenate([seg_fn(n)[:, k:k + Lout] for k in range(K)], axis=0)
            for n in range(N)
        ]
        slab = jnp.concatenate(slabs, axis=1) if N > 1 else slabs[0]
        return jnp.dot(w2d, slab, preferred_element_type=jnp.float32) + b_col

    def bn_swish(h, g, be):
        # training-mode BatchNorm1d: biased stats over batch and length, which
        # are both on the lane axis here -> a single lane reduction.
        mean = jnp.mean(h, axis=1, keepdims=True)
        var = jnp.mean(jnp.square(h - mean), axis=1, keepdims=True)
        y = (h - mean) * jax.lax.rsqrt(var + EPS) * g + be
        return y * jax.nn.sigmoid(y)  # Swish

    # three valid k=5 convs, each a single MXU matmul
    h1 = conv_valid(lambda n: x[n], L, 5, w1_ref[...], b1)                 # (Cout, N*L1)
    h2 = conv_valid(lambda n: h1[:, n * L1:n * L1 + L1], L1, 5, w23_ref[0], b2)  # (Cout, N*L2)
    h3 = conv_valid(lambda n: h2[:, n * L2:n * L2 + L2], L2, 5, w23_ref[1], b3)  # (Cout, N*L3)
    h3 = bn_swish(h3, g1, be1)

    # conv4: k=3, pad=1 -- build the padded im2col slab in registers.
    zcol = jnp.zeros((Cout, 1), jnp.float32)
    slabs = []
    for n in range(N):
        hn = h3[:, n * L3:n * L3 + L3]
        blk0 = jnp.concatenate([zcol, hn[:, :L3 - 1]], axis=1)   # p[:, l + 0]
        blk2 = jnp.concatenate([hn[:, 1:], zcol], axis=1)        # p[:, l + 2]
        slabs.append(jnp.concatenate([blk0, hn, blk2], axis=0))  # (3*Cout, L3)
    slab4 = jnp.concatenate(slabs, axis=1) if N > 1 else slabs[0]
    h4 = jnp.dot(w4_ref[...], slab4, preferred_element_type=jnp.float32) + b4
    h4 = bn_swish(h4, g2, be2)                                   # (Cout, N*L3)

    for n in range(N):
        o_ref[n] = h4[:, n * L3:n * L3 + L3].astype(o_ref.dtype)


def downsampling_conv_block_4l(x_ncl, params):
    """x_ncl: (N, Cin, L) float32 (PyTorch Conv1d layout). Returns (N, Cout, L-12)."""
    (w1, b1, w2, b2, w3, b3, g1, be1, w4, b4, g2, be2) = params
    N, Cin, L = x_ncl.shape
    Cout = w1.shape[0]
    L3 = L - 12

    # Pad input channels to a multiple of 8 so in-kernel sublane concats stay
    # tile-aligned; the matching weight rows are zero so the math is unchanged.
    Cin_p = max(8, ((Cin + 7) // 8) * 8)
    x_p = jnp.pad(x_ncl.astype(jnp.float32), ((0, 0), (0, Cin_p - Cin), (0, 0)))

    def im2col_w(w, ci_p):
        # torch (Cout, Ci, K) -> (Cout, K*ci_p), W[co, k*ci_p + ci] = w[co, ci, k]
        co, ci, k = w.shape
        w_pad = jnp.pad(w.astype(jnp.float32), ((0, 0), (0, ci_p - ci), (0, 0)))
        return jnp.transpose(w_pad, (0, 2, 1)).reshape(co, k * ci_p)

    w1_2d = im2col_w(w1, Cin_p)
    w23 = jnp.stack([im2col_w(w2, Cout), im2col_w(w3, Cout)], axis=0)
    w4_2d = im2col_w(w4, Cout)
    vec = jnp.stack([b1, b2, b3, b4, g1, be1, g2, be2], axis=1).astype(jnp.float32)

    args = (x_p, w1_2d, w23, w4_2d, vec)

    return pl.pallas_call(
        _block_kernel,
        out_shape=jax.ShapeDtypeStruct((N, Cout, L3), jnp.float32),
        in_specs=[pl.BlockSpec(memory_space=pltpu.MemorySpace.VMEM)] * len(args),
        out_specs=pl.BlockSpec(memory_space=pltpu.MemorySpace.VMEM),
    )(*args)


def _ref_forward(x_ncl, params):
    """Pure-JAX reference matching PyTorch semantics (NCL layout)."""
    (w1, b1, w2, b2, w3, b3, g1, be1, w4, b4, g2, be2) = params

    def conv(x, w, b, pad):
        y = jax.lax.conv_general_dilated(
            x, w, window_strides=(1,), padding=[(pad, pad)],
            dimension_numbers=('NCH', 'OIH', 'NCH'))
        return y + b[None, :, None]

    def bn(x, g, be):
        mean = jnp.mean(x, axis=(0, 2), keepdims=True)
        var = jnp.mean(jnp.square(x - mean), axis=(0, 2), keepdims=True)
        return (x - mean) / jnp.sqrt(var + EPS) * g[None, :, None] + be[None, :, None]

    def swish(x):
        return x * jax.nn.sigmoid(x)

    h = conv(x_ncl, w1, b1, 0)
    h = conv(h, w2, b2, 0)
    h = conv(h, w3, b3, 0)
    h = swish(bn(h, g1, be1))
    h = conv(h, w4, b4, 1)
    h = swish(bn(h, g2, be2))
    return h


if __name__ == "__main__":
    N, Cin, Cout, L = 2, 4, 8, 32
    key = jax.random.PRNGKey(0)
    ks = jax.random.split(key, 10)

    x = jax.random.normal(ks[0], (N, Cin, L), jnp.float32)

    # Deterministic synthetic parameter init (shapes from the module __init__).
    w1 = 0.30 * jax.random.normal(ks[1], (Cout, Cin, 5), jnp.float32)
    b1 = 0.10 * jax.random.normal(ks[2], (Cout,), jnp.float32)
    w2 = 0.20 * jax.random.normal(ks[3], (Cout, Cout, 5), jnp.float32)
    b2 = 0.10 * jax.random.normal(ks[4], (Cout,), jnp.float32)
    w3 = 0.20 * jax.random.normal(ks[5], (Cout, Cout, 5), jnp.float32)
    b3 = 0.10 * jax.random.normal(ks[6], (Cout,), jnp.float32)
    g1 = jnp.ones((Cout,), jnp.float32)    # BatchNorm1d default weight
    be1 = jnp.zeros((Cout,), jnp.float32)  # BatchNorm1d default bias
    w4 = 0.20 * jax.random.normal(ks[7], (Cout, Cout, 3), jnp.float32)
    b4 = 0.10 * jax.random.normal(ks[8], (Cout,), jnp.float32)
    g2 = jnp.ones((Cout,), jnp.float32)
    be2 = jnp.zeros((Cout,), jnp.float32)

    params = (w1, b1, w2, b2, w3, b3, g1, be1, w4, b4, g2, be2)

    out = jax.block_until_ready(downsampling_conv_block_4l(x, params))
    assert out.shape == (N, Cout, L - 12), out.shape

    ref = _ref_forward(x, params)
    max_err = float(jnp.max(jnp.abs(out - ref)))
    if not jnp.allclose(out, ref, atol=1e-3, rtol=1e-3):
        raise AssertionError(f"Pallas kernel mismatch vs reference, max err {max_err}")

    print("KERNEL_OK")
</pallas_src>

<mosaic_0001>
module attributes {stable_mosaic.version = 11 : i64} {
  func.func @_block_kernel(%arg0: memref<2x8x32xf32, #tpu.memory_space<vmem>>, %arg1: memref<8x40xf32, #tpu.memory_space<vmem>>, %arg2: memref<2x8x40xf32, #tpu.memory_space<vmem>>, %arg3: memref<8x24xf32, #tpu.memory_space<vmem>>, %arg4: memref<8x8xf32, #tpu.memory_space<vmem>>, %arg5: memref<2x8x20xf32, #tpu.memory_space<vmem>>) attributes {dimension_semantics = [], scalar_prefetch = 0 : i64, scratch_operands = 0 : i64, tpu.core_type = #tpu.core_type<tc>} {
    %c0 = arith.constant 0 : index
    %c0_0 = arith.constant 0 : index
    %c0_1 = arith.constant 0 : index
    %0 = vector.load %arg0[%c0, %c0_0, %c0_1] : memref<2x8x32xf32, #tpu.memory_space<vmem>>, vector<2x8x32xf32>
    %c0_2 = arith.constant 0 : index
    %c0_3 = arith.constant 0 : index
    %1 = vector.load %arg4[%c0_2, %c0_3] : memref<8x8xf32, #tpu.memory_space<vmem>>, vector<8x8xf32>
    %2 = vector.extract_strided_slice %1 {offsets = [0, 0], sizes = [8, 1], strides = [1, 1]} : vector<8x8xf32> to vector<8x1xf32>
    %3 = vector.extract_strided_slice %1 {offsets = [0, 1], sizes = [8, 1], strides = [1, 1]} : vector<8x8xf32> to vector<8x1xf32>
    %4 = vector.extract_strided_slice %1 {offsets = [0, 2], sizes = [8, 1], strides = [1, 1]} : vector<8x8xf32> to vector<8x1xf32>
    %5 = vector.extract_strided_slice %1 {offsets = [0, 3], sizes = [8, 1], strides = [1, 1]} : vector<8x8xf32> to vector<8x1xf32>
    %6 = vector.extract_strided_slice %1 {offsets = [0, 4], sizes = [8, 1], strides = [1, 1]} : vector<8x8xf32> to vector<8x1xf32>
    %7 = vector.extract_strided_slice %1 {offsets = [0, 5], sizes = [8, 1], strides = [1, 1]} : vector<8x8xf32> to vector<8x1xf32>
    %8 = vector.extract_strided_slice %1 {offsets = [0, 6], sizes = [8, 1], strides = [1, 1]} : vector<8x8xf32> to vector<8x1xf32>
    %9 = vector.extract_strided_slice %1 {offsets = [0, 7], sizes = [8, 1], strides = [1, 1]} : vector<8x8xf32> to vector<8x1xf32>
    %c0_4 = arith.constant 0 : index
    %c0_5 = arith.constant 0 : index
    %10 = vector.load %arg1[%c0_4, %c0_5] : memref<8x40xf32, #tpu.memory_space<vmem>>, vector<8x40xf32>
    %11 = vector.extract_strided_slice %0 {offsets = [0, 0, 0], sizes = [1, 8, 32], strides = [1, 1, 1]} : vector<2x8x32xf32> to vector<1x8x32xf32>
    %12 = vector.shape_cast %11 : vector<1x8x32xf32> to vector<8x32xf32>
    %13 = vector.extract_strided_slice %12 {offsets = [0, 0], sizes = [8, 28], strides = [1, 1]} : vector<8x32xf32> to vector<8x28xf32>
    %14 = vector.extract_strided_slice %0 {offsets = [0, 0, 0], sizes = [1, 8, 32], strides = [1, 1, 1]} : vector<2x8x32xf32> to vector<1x8x32xf32>
    %15 = vector.shape_cast %14 : vector<1x8x32xf32> to vector<8x32xf32>
    %16 = vector.extract_strided_slice %15 {offsets = [0, 1], sizes = [8, 28], strides = [1, 1]} : vector<8x32xf32> to vector<8x28xf32>
    %17 = vector.extract_strided_slice %0 {offsets = [0, 0, 0], sizes = [1, 8, 32], strides = [1, 1, 1]} : vector<2x8x32xf32> to vector<1x8x32xf32>
    %18 = vector.shape_cast %17 : vector<1x8x32xf32> to vector<8x32xf32>
    %19 = vector.extract_strided_slice %18 {offsets = [0, 2], sizes = [8, 28], strides = [1, 1]} : vector<8x32xf32> to vector<8x28xf32>
    %20 = vector.extract_strided_slice %0 {offsets = [0, 0, 0], sizes = [1, 8, 32], strides = [1, 1, 1]} : vector<2x8x32xf32> to vector<1x8x32xf32>
    %21 = vector.shape_cast %20 : vector<1x8x32xf32> to vector<8x32xf32>
    %22 = vector.extract_strided_slice %21 {offsets = [0, 3], sizes = [8, 28], strides = [1, 1]} : vector<8x32xf32> to vector<8x28xf32>
    %23 = vector.extract_strided_slice %0 {offsets = [0, 0, 0], sizes = [1, 8, 32], strides = [1, 1, 1]} : vector<2x8x32xf32> to vector<1x8x32xf32>
    %24 = vector.shape_cast %23 : vector<1x8x32xf32> to vector<8x32xf32>
    %25 = vector.extract_strided_slice %24 {offsets = [0, 4], sizes = [8, 28], strides = [1, 1]} : vector<8x32xf32> to vector<8x28xf32>
    %26 = tpu.concatenate %13, %16, %19, %22, %25 in 0 : vector<8x28xf32>, vector<8x28xf32>, vector<8x28xf32>, vector<8x28xf32>, vector<8x28xf32> -> vector<40x28xf32>
    %27 = vector.extract_strided_slice %0 {offsets = [1, 0, 0], sizes = [1, 8, 32], strides = [1, 1, 1]} : vector<2x8x32xf32> to vector<1x8x32xf32>
    %28 = vector.shape_cast %27 : vector<1x8x32xf32> to vector<8x32xf32>
    %29 = vector.extract_strided_slice %28 {offsets = [0, 0], sizes = [8, 28], strides = [1, 1]} : vector<8x32xf32> to vector<8x28xf32>
    %30 = vector.extract_strided_slice %0 {offsets = [1, 0, 0], sizes = [1, 8, 32], strides = [1, 1, 1]} : vector<2x8x32xf32> to vector<1x8x32xf32>
    %31 = vector.shape_cast %30 : vector<1x8x32xf32> to vector<8x32xf32>
    %32 = vector.extract_strided_slice %31 {offsets = [0, 1], sizes = [8, 28], strides = [1, 1]} : vector<8x32xf32> to vector<8x28xf32>
    %33 = vector.extract_strided_slice %0 {offsets = [1, 0, 0], sizes = [1, 8, 32], strides = [1, 1, 1]} : vector<2x8x32xf32> to vector<1x8x32xf32>
    %34 = vector.shape_cast %33 : vector<1x8x32xf32> to vector<8x32xf32>
    %35 = vector.extract_strided_slice %34 {offsets = [0, 2], sizes = [8, 28], strides = [1, 1]} : vector<8x32xf32> to vector<8x28xf32>
    %36 = vector.extract_strided_slice %0 {offsets = [1, 0, 0], sizes = [1, 8, 32], strides = [1, 1, 1]} : vector<2x8x32xf32> to vector<1x8x32xf32>
    %37 = vector.shape_cast %36 : vector<1x8x32xf32> to vector<8x32xf32>
    %38 = vector.extract_strided_slice %37 {offsets = [0, 3], sizes = [8, 28], strides = [1, 1]} : vector<8x32xf32> to vector<8x28xf32>
    %39 = vector.extract_strided_slice %0 {offsets = [1, 0, 0], sizes = [1, 8, 32], strides = [1, 1, 1]} : vector<2x8x32xf32> to vector<1x8x32xf32>
    %40 = vector.shape_cast %39 : vector<1x8x32xf32> to vector<8x32xf32>
    %41 = vector.extract_strided_slice %40 {offsets = [0, 4], sizes = [8, 28], strides = [1, 1]} : vector<8x32xf32> to vector<8x28xf32>
    %42 = tpu.concatenate %29, %32, %35, %38, %41 in 0 : vector<8x28xf32>, vector<8x28xf32>, vector<8x28xf32>, vector<8x28xf32>, vector<8x28xf32> -> vector<40x28xf32>
    %43 = tpu.concatenate %26, %42 in 1 : vector<40x28xf32>, vector<40x28xf32> -> vector<40x56xf32>
    %cst = arith.constant dense<0.000000e+00> : vector<8x56xf32>
    %44 = tpu.matmul %10, %43, %cst {dimension_numbers = #tpu.dot_dimension_numbers<[1], [0], [0], [1], [0, 0, 1, 1], [], []>} : vector<8x40xf32>, vector<40x56xf32>, vector<8x56xf32> -> vector<8x56xf32>
    %45 = vector.broadcast %2 : vector<8x1xf32> to vector<8x56xf32>
    %46 = arith.addf %44, %45 : vector<8x56xf32>
    %c0_6 = arith.constant 0 : index
    %c0_7 = arith.constant 0 : index
    %c0_8 = arith.constant 0 : index
    %47 = vector.load %arg2[%c0_6, %c0_7, %c0_8] : memref<2x8x40xf32, #tpu.memory_space<vmem>>, vector<1x8x40xf32>
    %48 = vector.shape_cast %47 : vector<1x8x40xf32> to vector<8x40xf32>
    %49 = vector.extract_strided_slice %46 {offsets = [0, 0], sizes = [8, 28], strides = [1, 1]} : vector<8x56xf32> to vector<8x28xf32>
    %50 = vector.extract_strided_slice %49 {offsets = [0, 0], sizes = [8, 24], strides = [1, 1]} : vector<8x28xf32> to vector<8x24xf32>
    %51 = vector.extract_strided_slice %46 {offsets = [0, 0], sizes = [8, 28], strides = [1, 1]} : vector<8x56xf32> to vector<8x28xf32>
    %52 = vector.extract_strided_slice %51 {offsets = [0, 1], sizes = [8, 24], strides = [1, 1]} : vector<8x28xf32> to vector<8x24xf32>
    %53 = vector.extract_strided_slice %46 {offsets = [0, 0], sizes = [8, 28], strides = [1, 1]} : vector<8x56xf32> to vector<8x28xf32>
    %54 = vector.extract_strided_slice %53 {offsets = [0, 2], sizes = [8, 24], strides = [1, 1]} : vector<8x28xf32> to vector<8x24xf32>
    %55 = vector.extract_strided_slice %46 {offsets = [0, 0], sizes = [8, 28], strides = [1, 1]} : vector<8x56xf32> to vector<8x28xf32>
    %56 = vector.extract_strided_slice %55 {offsets = [0, 3], sizes = [8, 24], strides = [1, 1]} : vector<8x28xf32> to vector<8x24xf32>
    %57 = vector.extract_strided_slice %46 {offsets = [0, 0], sizes = [8, 28], strides = [1, 1]} : vector<8x56xf32> to vector<8x28xf32>
    %58 = vector.extract_strided_slice %57 {offsets = [0, 4], sizes = [8, 24], strides = [1, 1]} : vector<8x28xf32> to vector<8x24xf32>
    %59 = tpu.concatenate %50, %52, %54, %56, %58 in 0 : vector<8x24xf32>, vector<8x24xf32>, vector<8x24xf32>, vector<8x24xf32>, vector<8x24xf32> -> vector<40x24xf32>
    %60 = vector.extract_strided_slice %46 {offsets = [0, 28], sizes = [8, 28], strides = [1, 1]} : vector<8x56xf32> to vector<8x28xf32>
    %61 = vector.extract_strided_slice %60 {offsets = [0, 0], sizes = [8, 24], strides = [1, 1]} : vector<8x28xf32> to vector<8x24xf32>
    %62 = vector.extract_strided_slice %46 {offsets = [0, 28], sizes = [8, 28], strides = [1, 1]} : vector<8x56xf32> to vector<8x28xf32>
    %63 = vector.extract_strided_slice %62 {offsets = [0, 1], sizes = [8, 24], strides = [1, 1]} : vector<8x28xf32> to vector<8x24xf32>
    %64 = vector.extract_strided_slice %46 {offsets = [0, 28], sizes = [8, 28], strides = [1, 1]} : vector<8x56xf32> to vector<8x28xf32>
    %65 = vector.extract_strided_slice %64 {offsets = [0, 2], sizes = [8, 24], strides = [1, 1]} : vector<8x28xf32> to vector<8x24xf32>
    %66 = vector.extract_strided_slice %46 {offsets = [0, 28], sizes = [8, 28], strides = [1, 1]} : vector<8x56xf32> to vector<8x28xf32>
    %67 = vector.extract_strided_slice %66 {offsets = [0, 3], sizes = [8, 24], strides = [1, 1]} : vector<8x28xf32> to vector<8x24xf32>
    %68 = vector.extract_strided_slice %46 {offsets = [0, 28], sizes = [8, 28], strides = [1, 1]} : vector<8x56xf32> to vector<8x28xf32>
    %69 = vector.extract_strided_slice %68 {offsets = [0, 4], sizes = [8, 24], strides = [1, 1]} : vector<8x28xf32> to vector<8x24xf32>
    %70 = tpu.concatenate %61, %63, %65, %67, %69 in 0 : vector<8x24xf32>, vector<8x24xf32>, vector<8x24xf32>, vector<8x24xf32>, vector<8x24xf32> -> vector<40x24xf32>
    %71 = tpu.concatenate %59, %70 in 1 : vector<40x24xf32>, vector<40x24xf32> -> vector<40x48xf32>
    %cst_9 = arith.constant dense<0.000000e+00> : vector<8x48xf32>
    %72 = tpu.matmul %48, %71, %cst_9 {dimension_numbers = #tpu.dot_dimension_numbers<[1], [0], [0], [1], [0, 0, 1, 1], [], []>} : vector<8x40xf32>, vector<40x48xf32>, vector<8x48xf32> -> vector<8x48xf32>
    %73 = vector.broadcast %3 : vector<8x1xf32> to vector<8x48xf32>
    %74 = arith.addf %72, %73 : vector<8x48xf32>
    %c1 = arith.constant 1 : index
    %c0_10 = arith.constant 0 : index
    %c0_11 = arith.constant 0 : index
    %75 = vector.load %arg2[%c1, %c0_10, %c0_11] : memref<2x8x40xf32, #tpu.memory_space<vmem>>, vector<1x8x40xf32>
    %76 = vector.shape_cast %75 : vector<1x8x40xf32> to vector<8x40xf32>
    %77 = vector.extract_strided_slice %74 {offsets = [0, 0], sizes = [8, 24], strides = [1, 1]} : vector<8x48xf32> to vector<8x24xf32>
    %78 = vector.extract_strided_slice %77 {offsets = [0, 0], sizes = [8, 20], strides = [1, 1]} : vector<8x24xf32> to vector<8x20xf32>
    %79 = vector.extract_strided_slice %74 {offsets = [0, 0], sizes = [8, 24], strides = [1, 1]} : vector<8x48xf32> to vector<8x24xf32>
    %80 = vector.extract_strided_slice %79 {offsets = [0, 1], sizes = [8, 20], strides = [1, 1]} : vector<8x24xf32> to vector<8x20xf32>
    %81 = vector.extract_strided_slice %74 {offsets = [0, 0], sizes = [8, 24], strides = [1, 1]} : vector<8x48xf32> to vector<8x24xf32>
    %82 = vector.extract_strided_slice %81 {offsets = [0, 2], sizes = [8, 20], strides = [1, 1]} : vector<8x24xf32> to vector<8x20xf32>
    %83 = vector.extract_strided_slice %74 {offsets = [0, 0], sizes = [8, 24], strides = [1, 1]} : vector<8x48xf32> to vector<8x24xf32>
    %84 = vector.extract_strided_slice %83 {offsets = [0, 3], sizes = [8, 20], strides = [1, 1]} : vector<8x24xf32> to vector<8x20xf32>
    %85 = vector.extract_strided_slice %74 {offsets = [0, 0], sizes = [8, 24], strides = [1, 1]} : vector<8x48xf32> to vector<8x24xf32>
    %86 = vector.extract_strided_slice %85 {offsets = [0, 4], sizes = [8, 20], strides = [1, 1]} : vector<8x24xf32> to vector<8x20xf32>
    %87 = tpu.concatenate %78, %80, %82, %84, %86 in 0 : vector<8x20xf32>, vector<8x20xf32>, vector<8x20xf32>, vector<8x20xf32>, vector<8x20xf32> -> vector<40x20xf32>
    %88 = vector.extract_strided_slice %74 {offsets = [0, 24], sizes = [8, 24], strides = [1, 1]} : vector<8x48xf32> to vector<8x24xf32>
    %89 = vector.extract_strided_slice %88 {offsets = [0, 0], sizes = [8, 20], strides = [1, 1]} : vector<8x24xf32> to vector<8x20xf32>
    %90 = vector.extract_strided_slice %74 {offsets = [0, 24], sizes = [8, 24], strides = [1, 1]} : vector<8x48xf32> to vector<8x24xf32>
    %91 = vector.extract_strided_slice %90 {offsets = [0, 1], sizes = [8, 20], strides = [1, 1]} : vector<8x24xf32> to vector<8x20xf32>
    %92 = vector.extract_strided_slice %74 {offsets = [0, 24], sizes = [8, 24], strides = [1, 1]} : vector<8x48xf32> to vector<8x24xf32>
    %93 = vector.extract_strided_slice %92 {offsets = [0, 2], sizes = [8, 20], strides = [1, 1]} : vector<8x24xf32> to vector<8x20xf32>
    %94 = vector.extract_strided_slice %74 {offsets = [0, 24], sizes = [8, 24], strides = [1, 1]} : vector<8x48xf32> to vector<8x24xf32>
    %95 = vector.extract_strided_slice %94 {offsets = [0, 3], sizes = [8, 20], strides = [1, 1]} : vector<8x24xf32> to vector<8x20xf32>
    %96 = vector.extract_strided_slice %74 {offsets = [0, 24], sizes = [8, 24], strides = [1, 1]} : vector<8x48xf32> to vector<8x24xf32>
    %97 = vector.extract_strided_slice %96 {offsets = [0, 4], sizes = [8, 20], strides = [1, 1]} : vector<8x24xf32> to vector<8x20xf32>
    %98 = tpu.concatenate %89, %91, %93, %95, %97 in 0 : vector<8x20xf32>, vector<8x20xf32>, vector<8x20xf32>, vector<8x20xf32>, vector<8x20xf32> -> vector<40x20xf32>
    %99 = tpu.concatenate %87, %98 in 1 : vector<40x20xf32>, vector<40x20xf32> -> vector<40x40xf32>
    %cst_12 = arith.constant dense<0.000000e+00> : vector<8x40xf32>
    %100 = tpu.matmul %76, %99, %cst_12 {dimension_numbers = #tpu.dot_dimension_numbers<[1], [0], [0], [1], [0, 0, 1, 1], [], []>} : vector<8x40xf32>, vector<40x40xf32>, vector<8x40xf32> -> vector<8x40xf32>
    %101 = vector.broadcast %4 : vector<8x1xf32> to vector<8x40xf32>
    %102 = arith.addf %100, %101 : vector<8x40xf32>
    %cst_13 = arith.constant dense<0.000000e+00> : vector<8xf32>
    %103 = vector.multi_reduction <add>, %102, %cst_13 [1] : vector<8x40xf32> to vector<8xf32>
    %104 = vector.shape_cast %103 : vector<8xf32> to vector<8x1xf32>
    %cst_14 = arith.constant 4.000000e+01 : f32
    %105 = vector.broadcast %cst_14 : f32 to vector<8x1xf32>
    %106 = arith.divf %104, %105 : vector<8x1xf32>
    %107 = vector.broadcast %106 : vector<8x1xf32> to vector<8x40xf32>
    %108 = arith.subf %102, %107 : vector<8x40xf32>
    %109 = arith.mulf %108, %108 : vector<8x40xf32>
    %cst_15 = arith.constant dense<0.000000e+00> : vector<8xf32>
    %110 = vector.multi_reduction <add>, %109, %cst_15 [1] : vector<8x40xf32> to vector<8xf32>
    %111 = vector.shape_cast %110 : vector<8xf32> to vector<8x1xf32>
    %cst_16 = arith.constant 4.000000e+01 : f32
    %112 = vector.broadcast %cst_16 : f32 to vector<8x1xf32>
    %113 = arith.divf %111, %112 : vector<8x1xf32>
    %114 = vector.broadcast %106 : vector<8x1xf32> to vector<8x40xf32>
    %115 = arith.subf %102, %114 : vector<8x40xf32>
    %cst_17 = arith.constant 9.99999974E-6 : f32
    %116 = vector.broadcast %cst_17 : f32 to vector<8x1xf32>
    %117 = arith.addf %113, %116 : vector<8x1xf32>
    %118 = math.rsqrt %117 : vector<8x1xf32>
    %119 = vector.broadcast %118 : vector<8x1xf32> to vector<8x40xf32>
    %120 = arith.mulf %115, %119 : vector<8x40xf32>
    %121 = vector.broadcast %6 : vector<8x1xf32> to vector<8x40xf32>
    %122 = arith.mulf %120, %121 : vector<8x40xf32>
    %123 = vector.broadcast %7 : vector<8x1xf32> to vector<8x40xf32>
    %124 = arith.addf %122, %123 : vector<8x40xf32>
    %125 = arith.negf %124 : vector<8x40xf32>
    %126 = math.exp %125 : vector<8x40xf32>
    %cst_18 = arith.constant 1.000000e+00 : f32
    %127 = vector.broadcast %cst_18 : f32 to vector<8x40xf32>
    %128 = arith.addf %127, %126 : vector<8x40xf32>
    %129 = arith.divf %127, %128 : vector<8x40xf32>
    %130 = arith.mulf %124, %129 : vector<8x40xf32>
    %cst_19 = arith.constant 0.000000e+00 : f32
    %131 = vector.broadcast %cst_19 : f32 to vector<8x1xf32>
    %132 = vector.extract_strided_slice %130 {offsets = [0, 0], sizes = [8, 20], strides = [1, 1]} : vector<8x40xf32> to vector<8x20xf32>
    %133 = vector.extract_strided_slice %132 {offsets = [0, 0], sizes = [8, 19], strides = [1, 1]} : vector<8x20xf32> to vector<8x19xf32>
    %134 = tpu.concatenate %131, %133 in 1 : vector<8x1xf32>, vector<8x19xf32> -> vector<8x20xf32>
    %135 = vector.extract_strided_slice %132 {offsets = [0, 1], sizes = [8, 19], strides = [1, 1]} : vector<8x20xf32> to vector<8x19xf32>
    %136 = tpu.concatenate %135, %131 in 1 : vector<8x19xf32>, vector<8x1xf32> -> vector<8x20xf32>
    %137 = tpu.concatenate %134, %132, %136 in 0 : vector<8x20xf32>, vector<8x20xf32>, vector<8x20xf32> -> vector<24x20xf32>
    %138 = vector.extract_strided_slice %130 {offsets = [0, 20], sizes = [8, 20], strides = [1, 1]} : vector<8x40xf32> to vector<8x20xf32>
    %139 = vector.extract_strided_slice %138 {offsets = [0, 0], sizes = [8, 19], strides = [1, 1]} : vector<8x20xf32> to vector<8x19xf32>
    %140 = tpu.concatenate %131, %139 in 1 : vector<8x1xf32>, vector<8x19xf32> -> vector<8x20xf32>
    %141 = vector.extract_strided_slice %138 {offsets = [0, 1], sizes = [8, 19], strides = [1, 1]} : vector<8x20xf32> to vector<8x19xf32>
    %142 = tpu.concatenate %141, %131 in 1 : vector<8x19xf32>, vector<8x1xf32> -> vector<8x20xf32>
    %143 = tpu.concatenate %140, %138, %142 in 0 : vector<8x20xf32>, vector<8x20xf32>, vector<8x20xf32> -> vector<24x20xf32>
    %144 = tpu.concatenate %137, %143 in 1 : vector<24x20xf32>, vector<24x20xf32> -> vector<24x40xf32>
    %c0_20 = arith.constant 0 : index
    %c0_21 = arith.constant 0 : index
    %145 = vector.load %arg3[%c0_20, %c0_21] : memref<8x24xf32, #tpu.memory_space<vmem>>, vector<8x24xf32>
    %cst_22 = arith.constant dense<0.000000e+00> : vector<8x40xf32>
    %146 = tpu.matmul %145, %144, %cst_22 {dimension_numbers = #tpu.dot_dimension_numbers<[1], [0], [0], [1], [0, 0, 1, 1], [], []>} : vector<8x24xf32>, vector<24x40xf32>, vector<8x40xf32> -> vector<8x40xf32>
    %147 = vector.broadcast %5 : vector<8x1xf32> to vector<8x40xf32>
    %148 = arith.addf %146, %147 : vector<8x40xf32>
    %cst_23 = arith.constant dense<0.000000e+00> : vector<8xf32>
    %149 = vector.multi_reduction <add>, %148, %cst_23 [1] : vector<8x40xf32> to vector<8xf32>
    %150 = vector.shape_cast %149 : vector<8xf32> to vector<8x1xf32>
    %cst_24 = arith.constant 4.000000e+01 : f32
    %151 = vector.broadcast %cst_24 : f32 to vector<8x1xf32>
    %152 = arith.divf %150, %151 : vector<8x1xf32>
    %153 = vector.broadcast %152 : vector<8x1xf32> to vector<8x40xf32>
    %154 = arith.subf %148, %153 : vector<8x40xf32>
    %155 = arith.mulf %154, %154 : vector<8x40xf32>
    %cst_25 = arith.constant dense<0.000000e+00> : vector<8xf32>
    %156 = vector.multi_reduction <add>, %155, %cst_25 [1] : vector<8x40xf32> to vector<8xf32>
    %157 = vector.shape_cast %156 : vector<8xf32> to vector<8x1xf32>
    %cst_26 = arith.constant 4.000000e+01 : f32
    %158 = vector.broadcast %cst_26 : f32 to vector<8x1xf32>
    %159 = arith.divf %157, %158 : vector<8x1xf32>
    %160 = vector.broadcast %152 : vector<8x1xf32> to vector<8x40xf32>
    %161 = arith.subf %148, %160 : vector<8x40xf32>
    %cst_27 = arith.constant 9.99999974E-6 : f32
    %162 = vector.broadcast %cst_27 : f32 to vector<8x1xf32>
    %163 = arith.addf %159, %162 : vector<8x1xf32>
    %164 = math.rsqrt %163 : vector<8x1xf32>
    %165 = vector.broadcast %164 : vector<8x1xf32> to vector<8x40xf32>
    %166 = arith.mulf %161, %165 : vector<8x40xf32>
    %167 = vector.broadcast %8 : vector<8x1xf32> to vector<8x40xf32>
    %168 = arith.mulf %166, %167 : vector<8x40xf32>
    %169 = vector.broadcast %9 : vector<8x1xf32> to vector<8x40xf32>
    %170 = arith.addf %168, %169 : vector<8x40xf32>
    %171 = arith.negf %170 : vector<8x40xf32>
    %172 = math.exp %171 : vector<8x40xf32>
    %cst_28 = arith.constant 1.000000e+00 : f32
    %173 = vector.broadcast %cst_28 : f32 to vector<8x40xf32>
    %174 = arith.addf %173, %172 : vector<8x40xf32>
    %175 = arith.divf %173, %174 : vector<8x40xf32>
    %176 = arith.mulf %170, %175 : vector<8x40xf32>
    %177 = vector.extract_strided_slice %176 {offsets = [0, 0], sizes = [8, 20], strides = [1, 1]} : vector<8x40xf32> to vector<8x20xf32>
    %c0_29 = arith.constant 0 : index
    %c0_30 = arith.constant 0 : index
    %c0_31 = arith.constant 0 : index
    %178 = vector.load %arg5[%c0_29, %c0_30, %c0_31] : memref<2x8x20xf32, #tpu.memory_space<vmem>>, vector<1x8x20xf32>
    %179 = vector.shape_cast %178 : vector<1x8x20xf32> to vector<8x20xf32>
    %180 = vector.shape_cast %177 : vector<8x20xf32> to vector<1x8x20xf32>
    tpu.vector_store %arg5[%c0_29, %c0_30, %c0_31], %180 {strides = array<i32>} : memref<2x8x20xf32, #tpu.memory_space<vmem>>, vector<1x8x20xf32>,
    %181 = vector.extract_strided_slice %176 {offsets = [0, 20], sizes = [8, 20], strides = [1, 1]} : vector<8x40xf32> to vector<8x20xf32>
    %c1_32 = arith.constant 1 : index
    %c0_33 = arith.constant 0 : index
    %c0_34 = arith.constant 0 : index
    %182 = vector.load %arg5[%c1_32, %c0_33, %c0_34] : memref<2x8x20xf32, #tpu.memory_space<vmem>>, vector<1x8x20xf32>
    %183 = vector.shape_cast %182 : vector<1x8x20xf32> to vector<8x20xf32>
    %184 = vector.shape_cast %181 : vector<8x20xf32> to vector<1x8x20xf32>
    tpu.vector_store %arg5[%c1_32, %c0_33, %c0_34], %184 {strides = array<i32>} : memref<2x8x20xf32, #tpu.memory_space<vmem>>, vector<1x8x20xf32>,
    return
  }
}

</mosaic_0001>

<bundles_post_ra>
// kernel: tpu_custom_call.1
= control target key start
LH: loop header
LB: loop body
LE: loop exit
PB: predicated region body
PF: predicated region fallthrough
CT: control target
= control target key end

     0   :  { %10 = vsyncpa [#allocation3], 0  ;;  %s1129_s0 = inlined_call_operand.hbm [shape: f32[2,8,32], index: 0, kind: input, shape index: {}]   ;;  %s1130_s1 = inlined_call_operand.hbm [shape: f32[8,40], index: 1, kind: input, shape index: {}]   ;;  %s1131_s2 = inlined_call_operand.hbm [shape: f32[2,8,40], index: 2, kind: input, shape index: {}]   ;;  %s1132_s3 = inlined_call_operand.vmem [shape: f32[8,24], index: 3, kind: input, shape index: {}]   ;;  %s1133_s4 = inlined_call_operand.hbm [shape: f32[8,8], index: 4, kind: input, shape index: {}]   ;;  %s1134_s5 = inlined_call_operand.hbm [shape: f32[2,8,20], index: 5, kind: output, shape index: {}]  }
   0x1   :  { %11 = vsyncpa [#allocation6], 0 }
   0x2   :  { %12 = vsyncpa [#allocation9], 0 }
   0x3   :  { %13 = vsyncpa [#allocation4], 0  ;;  %s906_s18 = smov [#allocation5]   ;;  %s907_s20 = smov [#allocation2]  }
   0x4   :  { %s32_s19 = sshll.u32 %s906_s18, 4  ;;  %s19_s21 = sshll.u32 %s907_s20, 4  ;;  %s33_s19 = int_to_ptr.vmem [resolvable:$true] %s32_s19  ;;  %s964_s21 = int_to_ptr.vmem [resolvable:$true] %s19_s21 }
   0x5   :  { %s788_s24 = scalar_lea.hbm %s1130_s1, 128 }
   0x6   :  { %p789_p0 = scmp.ne.s32.totalorder %s1130_s1, %s788_s24  ;;  %p792_p1 = scmp.lt.u32.totalorder %s788_s24, %s1130_s1 }
   0x8   :  { %p794_p2 = pnand %p792_p1, %p789_p0 }
   0xa   :  { %797 = shalt.err (!%p794_p2)
}
   0xb   :  { %s798_s29 = scalar_lea.vmem %s33_s19, 128  ;;  %p803_p4 = scmp.lt.s32.totalorder %s33_s19, %s33_s19 }
   0xc   :  { %p799_p3 = scmp.ne.s32.totalorder %s33_s19, %s798_s29  ;;  %p804_p5 = scmp.lt.s32.totalorder %s798_s29, %s798_s29 }
   0xe   :  { %p805_p6 = por %p804_p5, %p803_p4 }
  0x10   :  { %p806_p7 = pnand %p805_p6, %p799_p3 }
  0x12   :  { %809 = shalt.err (!%p806_p7)
}
  0x13   :  { %35 = dma.hbm_to_vmem [thread:$0]  %s1130_s1, 128, %s33_s19, [#allocation6]  }
  0x14   :  { %s810_s9 = scalar_lea.hbm %s1129_s0, 256 }
  0x15   :  { %p811_p8 = scmp.ne.s32.totalorder %s1129_s0, %s810_s9  ;;  %p814_p9 = scmp.lt.u32.totalorder %s810_s9, %s1129_s0 }
  0x17   :  { %p816_p10 = pnand %p814_p9, %p811_p8 }
  0x19   :  { %819 = shalt.err (!%p816_p10)
}
  0x1a   :  { %s820_s14 = scalar_lea.vmem %s964_s21, 256  ;;  %p825_p12 = scmp.lt.s32.totalorder %s964_s21, %s964_s21 }
  0x1b   :  { %p821_p11 = scmp.ne.s32.totalorder %s964_s21, %s820_s14  ;;  %p826_p13 = scmp.lt.s32.totalorder %s820_s14, %s820_s14 }
  0x1d   :  { %p827_p0 = por %p826_p13, %p825_p12 }
  0x1f   :  { %p828_p1 = pnand %p827_p0, %p821_p11 }
  0x21   :  { %831 = shalt.err (!%p828_p1)
}
  0x22   :  { %s908_s1 = smov 128   ;;  %s909_s15 = smov 8  }
  0x23   :  { %25 = dma.hbm_to_vmem [thread:$0]  %s1129_s0, 256, %s964_s21, [#allocation3], %s908_s1, %s908_s1, %s909_s15  }
  0x24   :  { %s910_s18 = smov [#allocation7]   ;;  %s911_s20 = smov [#allocation8]  }
  0x25   :  { %s41_s19 = sshll.u32 %s910_s18, 4  ;;  %s56_s22 = sshll.u32 %s911_s20, 4  ;;  %s42_s19 = int_to_ptr.vmem [resolvable:$true] %s41_s19  ;;  %s57_s22 = int_to_ptr.vmem [resolvable:$true] %s56_s22 }
  0x26   :  { %s832_s25 = scalar_lea.hbm %s1131_s2, 256 }
  0x27   :  { %p833_p2 = scmp.ne.s32.totalorder %s1131_s2, %s832_s25  ;;  %p836_p3 = scmp.lt.u32.totalorder %s832_s25, %s1131_s2 }
  0x29   :  { %p838_p4 = pnand %p836_p3, %p833_p2 }
  0x2b   :  { %841 = shalt.err (!%p838_p4)
}
  0x2c   :  { %s842_s0 = scalar_lea.vmem %s42_s19, 256  ;;  %p847_p6 = scmp.lt.s32.totalorder %s42_s19, %s42_s19 }
  0x2d   :  { %p843_p5 = scmp.ne.s32.totalorder %s42_s19, %s842_s0  ;;  %p848_p7 = scmp.lt.s32.totalorder %s842_s0, %s842_s0 }
  0x2f   :  { %p849_p8 = por %p848_p7, %p847_p6 }
  0x31   :  { %p850_p9 = pnand %p849_p8, %p843_p5 }
  0x33   :  { %853 = shalt.err (!%p850_p9)
}
  0x34   :  { %47 = dma.hbm_to_vmem [thread:$0]  %s1131_s2, 256, %s42_s19, [#allocation6], %s908_s1, %s908_s1, %s909_s15  }
  0x35   :  { %s854_s8 = scalar_lea.hbm %s1133_s4, 128 }
  0x36   :  { %p855_p10 = scmp.ne.s32.totalorder %s1133_s4, %s854_s8  ;;  %p858_p11 = scmp.lt.u32.totalorder %s854_s8, %s1133_s4 }
  0x38   :  { %p860_p12 = pnand %p858_p11, %p855_p10 }
  0x3a   :  { %863 = shalt.err (!%p860_p12)
}
  0x3b   :  { %s864_s13 = scalar_lea.vmem %s57_s22, 128  ;;  %p869_p0 = scmp.lt.s32.totalorder %s57_s22, %s57_s22 }
  0x3c   :  { %p865_p13 = scmp.ne.s32.totalorder %s57_s22, %s864_s13  ;;  %p870_p1 = scmp.lt.s32.totalorder %s864_s13, %s864_s13 }
  0x3e   :  { %p871_p2 = por %p870_p1, %p869_p0 }
  0x40   :  { %p872_p3 = pnand %p871_p2, %p865_p13 }
  0x42   :  { %875 = shalt.err (!%p872_p3)
}
  0x43   :  { %59 = dma.hbm_to_vmem [thread:$0]  %s1133_s4, 128, %s57_s22, [#allocation9]  }
  0x44   :  { %898 = dma.done.wait [#allocation3], 256  }
  0x45   :  { %899 = vsyncadd [#allocation3], 4294967040 }
  0x46   :  { %900 = dma.done.wait [#allocation6], 384  }
  0x47   :  { %901 = vsyncadd [#allocation6], 4294966912 }
  0x48   :  { %902 = dma.done.wait [#allocation9], 128  }
  0x49   :  { %903 = vsyncadd [#allocation9], 4294967168  ;;  %v73_v0 = vld [vmem:[#allocation2 + $0x8] sm:$0xff]  ;;  %s912_s16 = smov 127   ;;  %s913_s17 = smov 125   ;;  %v72_v1 = vld [vmem:[#allocation2] sm:$0xff] }
  0x4a   :  { %90 = vrot.lane.b32.xlu0 %v73_v0, %s912_s16  ;;  %94 = vrot.lane.b32.xlu1 %v73_v0, %s913_s17  ;;  %s914_s18 = smov 126   ;;  %s915_s19 = smov 124   ;;  %v916_v2 = vmov 0.0|0.0   ;;  %vm918_vm0 = vmmov 0   ;;  %v919_v6 = vmov 0.0   ;;  %v920_v9 = vmov 0  }
  0x4b   :  { %693 = vmatprep.subr.bf16.mxu0 %v916_v2  ;;  %699 = vmatprep.subr.bf16.mxu1 %v916_v2  ;;  %s917_s4 = smov 28   ;;  %v1039_v11 = vld [vmem:[#allocation8] sm:$0xff]  ;;  %vm113_vm1 = vcmask 228352   ;;  %v75_v30 = vld [vmem:[#allocation5] sm:$0xff]  ;;  %vm124_vm2 = vcmask 326656   ;;  %v921_v40 = vmov 1  }
  0x4c   :  { %655 = vmatprep.mubr.msk.f32.mxu0 %vm918_vm0, %v919_v6  ;;  %668 = vmatprep.mubr.msk.f32.mxu1 %vm918_vm0, %v919_v6  ;;  %vm224_vm3 = vcmask 195584   ;;  %v198_v52 = vld [vmem:[#allocation7] sm:$0xff]  ;;  %v922_v63 = vmov 2   ;;  %vm334_vm4 = vcmask 162816   ;;  %s925_s20 = smov 109   ;;  %s926_s22 = smov 108  }
  0x4d   :  { %752 = vset.pattern.permute.xlu1 %v920_v9  ;;  %s927_s23 = smov 107   ;;  %s928_s24 = smov 1   ;;  %vm452_vm5 = vcmask 7168   ;;  %vm457_vm6 = vcmask 154624  }
  0x4e   :  { %92 = vrot.lane.b32.xlu0 %v73_v0, %s914_s18  ;;  %96 = vrot.lane.b32.xlu1 %v73_v0, %s915_s19  ;;  %s930_s25 = smov 20  }
  0x52   :  { %77 = vrot.lane.b32.xlu0 %v72_v1, %s912_s16 }
  0x56   :  { %80 = vrot.lane.b32.xlu0 %v72_v1, %s914_s18 }
  0xbc   :  { %v91_v3 = vpop.permute.xlu0 %90  ;;  %v95_v5 = vpop.permute.xlu1 %94 }
  0xbd   :  { %v742_v4 = vpack.i.bf16 %v91_v3, %v73_v0 }
  0xbf   :  { %743 = vrot.lane.b32.xlu1 %v742_v4, %s917_s4 }
  0xc0   :  { %v93_v7 = vpop.permute.xlu0 %92  ;;  %v97_v10 = vpop.permute.xlu1 %96 }
  0xc1   :  { %v747_v8 = vpack.i.bf16 %v95_v5, %v93_v7 }
  0xc3   :  { %748 = vrot.lane.b32.xlu0 %v747_v8, %s917_s4  ;;  %83 = vrot.lane.b32.xlu1 %v72_v1, %s913_s17 }
  0xc4   :  { %v78_v12 = vpop.permute.xlu0 %77 }
  0xc7   :  { %86 = vrot.lane.b32.xlu1 %v72_v1, %s915_s19  ;;  %106 = vrot.lane.b32.xlu0 %v97_v10, %s917_s4 }
  0xc8   :  { %v81_v13 = vpop.permute.xlu0 %80 }
  0xcb   :  { %121 = vperm.xlu1 %752, %v1039_v11  }
  0xcf   :  { %758 = vset.pattern.permute.xlu1 %v921_v40 }
 0x131   :  { %v744_v14 = vpop.permute.xlu1 %743 }
 0x132   :  { %v746_v15 = vunpack.i.h.bf16 %v744_v14  ;;  %v745_v16 = vunpack.i.l.bf16 %v744_v14  ;;  %v308_v14 = vld [vmem:[#allocation7 + $0x8] sm:$0xff] }
 0x134   :  { %v114_v17 = vsel %vm113_vm1, %v72_v1, %v745_v16  ;;  %v115_v18 = vsel %vm113_vm1, %v78_v12, %v746_v15 }
 0x135   :  { %v749_v19 = vpop.permute.xlu0 %748  ;;  %v84_v20 = vpop.permute.xlu1 %83  ;;  %v694_v21 = vpack.c.bf16 %v115_v18, %v114_v17 }
 0x136   :  { %v751_v22 = vunpack.i.h.bf16 %v749_v19  ;;  %v750_v23 = vunpack.i.l.bf16 %v749_v19 }
 0x137   :  { %695 = vmatpush3.bf16.msra.mxu0 %v694_v21  ;;  %v924_v21 = vmov 5  }
 0x138   :  { %v116_v24 = vsel %vm113_vm1, %v81_v13, %v750_v23  ;;  %v117_v25 = vsel %vm113_vm1, %v84_v20, %v751_v22  ;;  %696 = vmatprep.subr.bf16.mxu0 %v916_v2  ;;  %v923_v20 = vmov 4  }
 0x139   :  { %v697_v26 = vpack.c.bf16 %v117_v25, %v116_v24  ;;  %v87_v27 = vpop.permute.xlu1 %86  ;;  %v107_v28 = vpop.permute.xlu0 %106  ;;  %765 = vset.pattern.permute.xlu0 %v923_v20 }
 0x13a   :  { %v118_v29 = vsel %vm113_vm1, %v87_v27, %v107_v28 }
 0x13b   :  { %698 = vmatpush3.bf16.msra.mxu0 %v697_v26 }
 0x13c   :  { %653 = vmatprep.subr.mxu0 %v919_v6 }
 0x13f   :  { %654 = vmatpush3.msra.mxu0 %v118_v29 }
 0x140   :  { %656 = vmatmul.mubr.msk.f32.vlgmr.msra.gmra.mrb[0].mxu0 %vm124_vm2, %v75_v30  ;;  %705 = vmatprep.subr.bf16.mxu0 %v916_v2 }
 0x141   :  { %681 = vmatprep.mubr.msk.f32.mxu0 %vm918_vm0, %v919_v6 }
 0x14a   :  { %v122_v31 = vpop.permute.xlu1 %121 }
 0x213   :  { %v194_v32 = vpop.f32.mrb[0].mxu0 }
 0x214   :  { %v195_v33 = vadd.f32 %v194_v32, %v122_v31  ;;  %v657_v34 = vpop.f32.mrb[1].mxu0 }
 0x216   :  { %203 = vrot.lane.b32.xlu1 %v195_v33, %s914_s18  ;;  %200 = vrot.lane.b32.xlu0 %v195_v33, %s912_s16 }
 0x21a   :  { %209 = vrot.lane.b32.xlu1 %v195_v33, %s915_s19  ;;  %206 = vrot.lane.b32.xlu0 %v195_v33, %s913_s17 }
 0x288   :  { %v204_v35 = vpop.permute.xlu1 %203  ;;  %v201_v36 = vpop.permute.xlu0 %200 }
 0x289   :  { %212 = vrot.lane.b32.xlu0 %v201_v36, %s915_s19 }
 0x28c   :  { %v210_v37 = vpop.permute.xlu1 %209  ;;  %v207_v38 = vpop.permute.xlu0 %206 }
 0x28d   :  { %v753_v39 = vpack.i.bf16 %v207_v38, %v204_v35  ;;  %218 = vrot.lane.b32.xlu0 %v210_v37, %s915_s19  ;;  %v225_v43 = vsel %vm224_vm3, %v195_v33, %v210_v37 }
 0x28f   :  { %754 = vrot.lane.b32.xlu1 %v753_v39, %s915_s19 }
 0x293   :  { %231 = vperm.xlu1 %758, %v1039_v11  }
 0x297   :  { %764 = vset.pattern.permute.xlu1 %v922_v63 }
 0x2fb   :  { %v213_v41 = vpop.permute.xlu0 %212 }
 0x2fc   :  { %v226_v42 = vsel %vm224_vm3, %v201_v36, %v213_v41 }
 0x2fd   :  { %v700_v44 = vpack.c.bf16 %v226_v42, %v225_v43 }
 0x2ff   :  { %701 = vmatpush3.bf16.msra.mxu1 %v700_v44  ;;  %v219_v51 = vpop.permute.xlu0 %218 }
 0x300   :  { %702 = vmatprep.subr.bf16.mxu1 %v916_v2  ;;  %v229_v53 = vsel %vm224_vm3, %v210_v37, %v219_v51 }
 0x301   :  { %v755_v45 = vpop.permute.xlu1 %754 }
 0x302   :  { %v757_v46 = vunpack.i.h.bf16 %v755_v45  ;;  %v756_v47 = vunpack.i.l.bf16 %v755_v45  ;;  %v929_v45 = vmov 3  }
 0x304   :  { %v227_v48 = vsel %vm224_vm3, %v204_v35, %v756_v47  ;;  %v228_v49 = vsel %vm224_vm3, %v207_v38, %v757_v46 }
 0x305   :  { %v703_v50 = vpack.c.bf16 %v228_v49, %v227_v48 }
 0x307   :  { %704 = vmatpush3.bf16.msra.mxu1 %v703_v50 }
 0x308   :  { %666 = vmatprep.subr.mxu1 %v919_v6 }
 0x30b   :  { %667 = vmatpush3.msra.mxu1 %v229_v53 }
 0x30c   :  { %669 = vmatmul.mubr.msk.f32.vlgmr.msra.gmra.mrb[0].mxu1 %vm124_vm2, %v198_v52  ;;  %711 = vmatprep.subr.bf16.mxu1 %v916_v2 }
 0x30d   :  { %690 = vmatprep.mubr.msk.f32.mxu1 %vm918_vm0, %v919_v6 }
 0x312   :  { %v232_v54 = vpop.permute.xlu1 %231 }
 0x3df   :  { %v303_v55 = vpop.f32.mrb[0].mxu1 }
 0x3e0   :  { %v304_v56 = vadd.f32 %v303_v55, %v232_v54  ;;  %v670_v57 = vpop.f32.mrb[1].mxu1 }
 0x3e2   :  { %313 = vrot.lane.b32.xlu1 %v304_v56, %s914_s18  ;;  %310 = vrot.lane.b32.xlu0 %v304_v56, %s912_s16 }
 0x3e6   :  { %319 = vrot.lane.b32.xlu1 %v304_v56, %s915_s19  ;;  %316 = vrot.lane.b32.xlu0 %v304_v56, %s913_s17 }
 0x454   :  { %v314_v58 = vpop.permute.xlu1 %313  ;;  %v311_v59 = vpop.permute.xlu0 %310 }
 0x455   :  { %322 = vrot.lane.b32.xlu0 %v311_v59, %s915_s19 }
 0x458   :  { %v320_v60 = vpop.permute.xlu1 %319  ;;  %v317_v61 = vpop.permute.xlu0 %316 }
 0x459   :  { %v759_v62 = vpack.i.bf16 %v317_v61, %v314_v58  ;;  %328 = vrot.lane.b32.xlu0 %v320_v60, %s915_s19  ;;  %v335_v1 = vsel %vm334_vm4, %v304_v56, %v320_v60 }
 0x45b   :  { %760 = vrot.lane.b32.xlu1 %v759_v62, %s915_s19 }
 0x45f   :  { %341 = vperm.xlu1 %764, %v1039_v11  }
 0x463   :  { %766 = vset.pattern.permute.xlu1 %v924_v21 }
 0x4c7   :  { %v323_v0 = vpop.permute.xlu0 %322 }
 0x4c8   :  { %v336_v3 = vsel %vm334_vm4, %v311_v59, %v323_v0  ;;  %v483_v59 = vld [vmem:[%s1132_s3] sm:$0xff]  ;;  %s933_s3 = smov [#allocation10]  }
 0x4c9   :  { %v706_v4 = vpack.c.bf16 %v336_v3, %v335_v1  ;;  %v931_v3 = vmov 6   ;;  %s603_s28 = sshll.u32 %s933_s3, 4  ;;  %s604_s28 = int_to_ptr.vmem [resolvable:$true] %s603_s28 }
 0x4ca   :  { %s876_s29 = scalar_lea.vmem %s604_s28, 256  ;;  %p881_p5 = scmp.lt.s32.totalorder %s604_s28, %s604_s28 }
 0x4cb   :  { %707 = vmatpush3.bf16.msra.mxu0 %v706_v4  ;;  %v329_v13 = vpop.permute.xlu0 %328  ;;  %p877_p4 = scmp.ne.s32.totalorder %s604_s28, %s876_s29  ;;  %p882_p6 = scmp.lt.s32.totalorder %s876_s29, %s876_s29 }
 0x4cc   :  { %708 = vmatprep.subr.bf16.mxu0 %v916_v2  ;;  %v339_v15 = vsel %vm334_vm4, %v320_v60, %v329_v13 }
 0x4cd   :  { %v761_v5 = vpop.permute.xlu1 %760  ;;  %p883_p7 = por %p882_p6, %p881_p5 }
 0x4ce   :  { %v763_v7 = vunpack.i.h.bf16 %v761_v5  ;;  %v762_v8 = vunpack.i.l.bf16 %v761_v5 }
 0x4cf   :  { %p884_p8 = pnand %p883_p7, %p877_p4 }
 0x4d0   :  { %v338_v9 = vsel %vm334_vm4, %v317_v61, %v763_v7  ;;  %v337_v10 = vsel %vm334_vm4, %v314_v58, %v762_v8 }
 0x4d1   :  { %v709_v12 = vpack.c.bf16 %v338_v9, %v337_v10 }
 0x4d3   :  { %710 = vmatpush3.bf16.msra.mxu0 %v709_v12 }
 0x4d4   :  { %679 = vmatprep.subr.mxu0 %v919_v6 }
 0x4d7   :  { %680 = vmatpush3.msra.mxu0 %v339_v15 }
 0x4d8   :  { %682 = vmatmul.mubr.msk.f32.vlgmr.msra.gmra.mrb[2].mxu0 %vm124_vm2, %v308_v14 }
 0x4de   :  { %v342_v16 = vpop.permute.xlu1 %341 }
 0x5ab   :  { %v413_v2 = vpop.f32.mrb[2].mxu0 }
 0x5ac   :  { %v414_v17 = vadd.f32 %v413_v2, %v342_v16  ;;  %v683_v18 = vpop.f32.mrb[3].mxu0 }
 0x5ae   :  { %v417_v19 = vsel %vm124_vm2, %v414_v17, 0.0 }
 0x5af   :  { %418 = vadd.xlane.f32.xlu0 %v417_v19 }
 0x5c5   :  { %432 = vperm.xlu0 %765, %v1039_v11  }
 0x5c9   :  { %773 = vset.pattern.permute.xlu0 %v931_v3 }
 0x63c   :  { %v419_v22 = vpop.xlane.xlu0 %418 }
 0x63d   :  { %v421_v23 = vmul.f32 0.025, %v419_v22 }
 0x63f   :  { %v422_v24 = vsub.f32 %v414_v17, %v421_v23 }
 0x641   :  { %v423_v25 = vmul.f32 %v422_v24, %v422_v24 }
 0x643   :  { %v424_v26 = vsel %vm124_vm2, %v423_v25, 0.0 }
 0x644   :  { %425 = vadd.xlane.f32.xlu1 %v424_v26  ;;  %v433_v31 = vpop.permute.xlu0 %432 }
 0x655   :  { %437 = vperm.xlu1 %766, %v1039_v11  }
 0x659   :  { %772 = vset.pattern.permute.xlu1 %v929_v45 }
 0x6d1   :  { %v426_v27 = vpop.xlane.xlu1 %425 }
 0x6d2   :  { %v427_v28 = vmul.f32 0.025, %v426_v27 }
 0x6d4   :  { %v428_v29 = vadd.f32 1e-05, %v427_v28 }
 0x6d5   :  { %v438_v33 = vpop.permute.xlu1 %437 }
 0x6d6   :  { %776 = vrsqrt.f32 %v428_v29 }
 0x6e0   :  { %v777_v30 = vpop.eup %776 }
 0x6e1   :  { %v430_v32 = vmul.f32 %v777_v30, %v422_v24 }
 0x6e3   :  { %v435_v34 = vmul.f32 %v433_v31, %v430_v32 }
 0x6e5   :  { %v440_v35 = vadd.f32 %v438_v33, %v435_v34 }
 0x6e7   :  { %v620_v36 = vmul.f32 -1.442695, %v440_v35 }
 0x6e9   :  { %778 = vpow2.f32 %v620_v36 }
 0x6f3   :  { %v779_v37 = vpop.eup %778 }
 0x6f4   :  { %v444_v38 = vadd.f32 1.0, %v779_v37 }
 0x6f6   :  { %780 = vrcp.f32 %v444_v38 }
 0x700   :  { %v781_v39 = vpop.eup %780 }
 0x701   :  { %v447_v40 = vmul.f32 %v781_v39, %v440_v35 }
 0x703   :  { %459 = vrot.lane.b32.xlu1 %v447_v40, %s925_s20 }
 0x707   :  { %467 = vrot.lane.b32.xlu1 %v447_v40, %s926_s22 }
 0x70b   :  { %463 = vrot.lane.b32.xlu1 %v447_v40, %s927_s23 }
 0x70f   :  { %449 = vrot.lane.b32.xlu1 %v447_v40, %s928_s24 }
 0x775   :  { %v460_v41 = vpop.permute.xlu1 %459 }
 0x776   :  { %v462_v42 = vsel %vm452_vm5, 0.0, %v460_v41 }
 0x779   :  { %v468_v43 = vpop.permute.xlu1 %467 }
 0x77a   :  { %v767_v44 = vpack.i.bf16 %v468_v43, %v462_v42 }
 0x77c   :  { %768 = vrot.lane.b32.xlu1 %v767_v44, %s930_s25 }
 0x77d   :  { %v464_v46 = vpop.permute.xlu1 %463 }
 0x77e   :  { %v466_v47 = vsel %vm457_vm6, %v464_v46, 0.0 }
 0x77f   :  { %475 = vrot.lane.b32.xlu0 %v466_v47, %s930_s25 }
 0x780   :  { %454 = vrot.lane.b32.xlu1 %v447_v40, %s912_s16 }
 0x781   :  { %v450_v48 = vpop.permute.xlu1 %449 }
 0x782   :  { %v453_v52 = vsel %vm452_vm5, 0.0, %v450_v48 }
 0x784   :  { %485 = vperm.xlu1 %772, %v1039_v11  }
 0x7ee   :  { %v769_v49 = vpop.permute.xlu1 %768 }
 0x7ef   :  { %v771_v50 = vunpack.i.h.bf16 %v769_v49  ;;  %v770_v51 = vunpack.i.l.bf16 %v769_v49 }
 0x7f1   :  { %v481_v53 = vsel %vm334_vm4, %v447_v40, %v771_v50  ;;  %v480_v54 = vsel %vm334_vm4, %v453_v52, %v770_v51  ;;  %v476_v58 = vpop.permute.xlu0 %475 }
 0x7f2   :  { %v712_v55 = vpack.c.bf16 %v481_v53, %v480_v54  ;;  %v455_v56 = vpop.permute.xlu1 %454 }
 0x7f3   :  { %v458_v57 = vsel %vm457_vm6, %v455_v56, 0.0 }
 0x7f4   :  { %713 = vmatpush3.bf16.msra.mxu1 %v712_v55  ;;  %v482_v60 = vsel %vm334_vm4, %v458_v57, %v476_v58 }
 0x7f5   :  { %688 = vmatprep.subr.mxu1 %v919_v6  ;;  %v932_v6 = vmov 7  }
 0x7f6   :  { %774 = vset.pattern.permute.xlu1 %v932_v6 }
 0x7f8   :  { %689 = vmatpush3.msra.mxu1 %v482_v60 }
 0x7f9   :  { %691 = vmatmul.mubr.msk.f32.vlgmr.msra.gmra.mrb[2].mxu1 %vm224_vm3, %v483_v59 }
 0x803   :  { %v486_v61 = vpop.permute.xlu1 %485 }
 0x8cc   :  { %v557_v62 = vpop.f32.mrb[2].mxu1 }
 0x8cd   :  { %v558_v63 = vadd.f32 %v557_v62, %v486_v61  ;;  %v692_v0 = vpop.f32.mrb[3].mxu1 }
 0x8cf   :  { %v561_v1 = vsel %vm124_vm2, %v558_v63, 0.0 }
 0x8d0   :  { %562 = vadd.xlane.f32.xlu0 %v561_v1 }
 0x8e6   :  { %575 = vperm.xlu0 %773, %v1039_v11  }
 0x8ea   :  { %775 = vset.pattern.permute.xlu0 %v932_v6 }
 0x95d   :  { %v563_v4 = vpop.xlane.xlu0 %562 }
 0x95e   :  { %v564_v5 = vmul.f32 0.025, %v563_v4 }
 0x960   :  { %v565_v7 = vsub.f32 %v558_v63, %v564_v5 }
 0x962   :  { %v566_v8 = vmul.f32 %v565_v7, %v565_v7 }
 0x964   :  { %v567_v9 = vsel %vm124_vm2, %v566_v8, 0.0 }
 0x965   :  { %568 = vadd.xlane.f32.xlu1 %v567_v9  ;;  %v576_v15 = vpop.permute.xlu0 %575 }
 0x976   :  { %580 = vperm.xlu1 %774, %v1039_v11  }
 0x9f2   :  { %v569_v10 = vpop.xlane.xlu1 %568 }
 0x9f3   :  { %v570_v12 = vmul.f32 0.025, %v569_v10 }
 0x9f5   :  { %v571_v13 = vadd.f32 1e-05, %v570_v12 }
 0x9f6   :  { %v581_v2 = vpop.permute.xlu1 %580 }
 0x9f7   :  { %782 = vrsqrt.f32 %v571_v13 }
 0xa01   :  { %v783_v14 = vpop.eup %782 }
 0xa02   :  { %v573_v16 = vmul.f32 %v783_v14, %v565_v7 }
 0xa04   :  { %v578_v17 = vmul.f32 %v576_v15, %v573_v16 }
 0xa06   :  { %v583_v18 = vadd.f32 %v581_v2, %v578_v17 }
 0xa08   :  { %v622_v19 = vmul.f32 -1.442695, %v583_v18 }
 0xa0a   :  { %784 = vpow2.f32 %v622_v19 }
 0xa14   :  { %v785_v20 = vpop.eup %784 }
 0xa15   :  { %v587_v21 = vadd.f32 1.0, %v785_v20 }
 0xa17   :  { %786 = vrcp.f32 %v587_v21 }
 0xa21   :  { %v787_v22 = vpop.eup %786 }
 0xa22   :  { %v590_v23 = vmul.f32 %v787_v22, %v583_v18 }
 0xa24   :  { %591 = vst.msk [vmem:[#allocation10] sm:$0xff] %vm334_vm4, %v590_v23  ;;  %593 = vrot.lane.b32.xlu1 %v590_v23, %s926_s22 }
 0xa96   :  { %v594_v11 = vpop.permute.xlu1 %593 }
 0xa97   :  { %597 = vst.msk [vmem:[#allocation10 + $0x8] sm:$0xff] %vm334_vm4, %v594_v11 }
 0xa98   :  { %887 = shalt.err (!%p884_p8)
}
 0xa99   :  { %s888_s30 = scalar_lea.hbm %s1134_s5, 256 }
 0xa9a   :  { %p889_p9 = scmp.ne.s32.totalorder %s1134_s5, %s888_s30  ;;  %p892_p10 = scmp.lt.u32.totalorder %s888_s30, %s1134_s5 }
 0xa9c   :  { %p894_p11 = pnand %p892_p10, %p889_p9 }
 0xa9e   :  { %897 = shalt.err (!%p894_p11)
}
 0xa9f   :  { %609 = dma.vmem_to_hbm [thread:$0]  %s604_s28, 256, %s1134_s5, [#allocation4], %s908_s1, %s908_s1, %s909_s15  }
 0xaa0   :  { %904 = dma.done.wait [#allocation4], 256  }
 0xaa1   :  { %905 = vsyncadd [#allocation4], 4294967040 }
 0xaa2   :  { %613 = vsyncpa [#allocation3], 1 }
 0xaa3   :  { %614 = vsyncpa [#allocation6], 1 }
 0xaa4   :  { %615 = vsyncpa [#allocation9], 1 }
 0xaa5   :  { %616 = vsyncpa [#allocation4], 1 }

</bundles_post_ra>
